<compile_context>
chip_gen: v6e
topology: v6e:2x2x1
jax: 0.10.0
libtpu: 0.0.40
codegen_flags: <defaults>
</compile_context>

<pallas_src>
import functools

import jax
import jax.numpy as jnp
from jax.experimental import pallas as pl
from jax.experimental.pallas import tpu as pltpu

BN_EPS = 1e-5


# ----------------------------------------------------------------------------
# Tiling helpers (shared between parameter packing and the forward pass)
# ----------------------------------------------------------------------------
def _round_up(x, m):
    return (x + m - 1) // m * m


def _pick_k_tiling(K):
    """Return (tk, K_pad) for the contraction dimension (few, large K steps)."""
    K1 = _round_up(K, 128)
    if K1 <= 2048:
        return K1, K1                       # single K step, no extra padding
    for tk in (2048, 1792, 1536, 1280, 1024, 896, 768, 640, 512):
        if K1 % tk == 0:
            return tk, K1
    # No large divisor: pad K further so we still get few, large K steps.
    return 1024, _round_up(K1, 1024)


def _pick_m_tiling(M):
    # bf16 LHS packs 16 rows per sublane group: keep M blocks 16-aligned.
    M16 = _round_up(M, 16)
    if M16 <= 512:
        return M16, M16
    return 512, _round_up(M, 512)


def _pick_tn(N_pad, m_blocks):
    # Widest lane-dense tile, but keep >= 2 blocks across the parallel (i, j)
    # axes when M fits a single tile so v7x's second TensorCore has work.
    for tn in (512, 256, 128):
        if N_pad % tn:
            continue
        if m_blocks == 1 and (N_pad // tn) < 2 and tn > 128:
            continue
        return tn
    return N_pad


# ----------------------------------------------------------------------------
# Pallas kernel: fused matmul + BN scale/bias (+ residual) (+ ReLU), bf16 out
# ----------------------------------------------------------------------------
def _matmul_bn_act_kernel(*refs, relu, has_residual):
    if has_residual:
        x_ref, w_ref, s_ref, b_ref, r_ref, o_ref, acc_ref = refs
    else:
        x_ref, w_ref, s_ref, b_ref, o_ref, acc_ref = refs
        r_ref = None
    k = pl.program_id(2)

    # bf16 x bf16 -> f32 partial product on the MXU.
    part = jnp.dot(x_ref[...], w_ref[...], preferred_element_type=jnp.float32)

    @pl.when(k == 0)
    def _():
        acc_ref[...] = part            # no zero-init store + reload

    @pl.when(k > 0)
    def _():
        acc_ref[...] += part

    @pl.when(k == pl.num_programs(2) - 1)
    def _():
        y = acc_ref[...] * s_ref[...] + b_ref[...]
        if has_residual:
            y = y + r_ref[...].astype(jnp.float32)
        if relu:
            y = jnp.maximum(y, 0.0)
        o_ref[...] = y.astype(o_ref.dtype)   # bf16 store


# ----------------------------------------------------------------------------
# im2col patch extraction (plain-JAX glue, fused inside the jitted conv)
# ----------------------------------------------------------------------------
def _extract_patches(x, kh, kw, stride, dilation, padding, k_pad):
    """im2col in the activation dtype, K padding fused into the concat."""
    N, H, W, C = x.shape
    if padding:
        x = jnp.pad(x, ((0, 0), (padding, padding), (padding, padding), (0, 0)))
    Hp, Wp = H + 2 * padding, W + 2 * padding
    Ho = (Hp - (kh - 1) * dilation - 1) // stride + 1
    Wo = (Wp - (kw - 1) * dilation - 1) // stride + 1
    cols = []
    for i in range(kh):
        for j in range(kw):
            hi, wj = i * dilation, j * dilation
            cols.append(x[:, hi:hi + stride * (Ho - 1) + 1:stride,
                          wj:wj + stride * (Wo - 1) + 1:stride, :])
    K = kh * kw * C
    if k_pad > K:
        cols.append(jnp.zeros((N, Ho, Wo, k_pad - K), x.dtype))
    patches = jnp.concatenate(cols, axis=-1) if len(cols) > 1 else cols[0]
    return patches.reshape(N * Ho * Wo, k_pad), (N, Ho, Wo)


# TODO(synk): 3x3 convs still materialize the im2col patch matrix (9x activation bytes,
#             now in bf16); a direct shifted-window lowering over a (kh*kw) grid axis
#             would remove that materialization entirely.
@functools.partial(
    jax.jit,
    static_argnames=("kh", "kw", "cout", "stride", "dilation", "padding", "relu"))
def _conv2d_impl(x, w2, scale, bias, residual, *,
                 kh, kw, cout, stride, dilation, padding, relu):
    cin = x.shape[-1]
    K = kh * kw * cin
    tk, K_pad = _pick_k_tiling(K)
    assert w2.shape[0] == K_pad, (w2.shape, K_pad)
    N_pad = w2.shape[1]

    # All activations are bf16; this cast is a no-op for conv->conv chains and keeps
    # the im2col glue (the dominant HBM cost at this size) in 2-byte data.
    x = x.astype(jnp.bfloat16)
    cols, (n, ho, wo) = _extract_patches(x, kh, kw, stride, dilation, padding, K_pad)
    M = n * ho * wo
    tm, M_pad = _pick_m_tiling(M)
    tn = _pick_tn(N_pad, M_pad // tm)
    if M_pad > M:
        cols = jnp.pad(cols, ((0, M_pad - M), (0, 0)))

    has_res = residual is not None
    args = [cols, w2, scale, bias]
    in_specs = [
        pl.BlockSpec((tm, tk), lambda i, j, k: (i, k)),
        pl.BlockSpec((tk, tn), lambda i, j, k: (k, j)),
        pl.BlockSpec((1, tn), lambda i, j, k: (0, j)),
        pl.BlockSpec((1, tn), lambda i, j, k: (0, j)),
    ]
    if has_res:
        res = residual.astype(jnp.bfloat16).reshape(M, cout)
        if M_pad > M or N_pad > cout:
            res = jnp.pad(res, ((0, M_pad - M), (0, N_pad - cout)))
        args.append(res)
        # TODO(synk): pl.Buffered(1) on this k-invariant operand would halve its VMEM
        #             footprint; kept default double-buffering for robustness.
        in_specs.append(pl.BlockSpec((tm, tn), lambda i, j, k: (i, j)))

    # NOTE: accumulating across K in the VMEM scratch is only correct while K stays the
    # innermost grid axis and is marked "arbitrary" (do not reorder / parallelize it).
    out = pl.pallas_call(
        functools.partial(_matmul_bn_act_kernel, relu=relu, has_residual=has_res),
        out_shape=jax.ShapeDtypeStruct((M_pad, N_pad), jnp.bfloat16),
        grid=(M_pad // tm, N_pad // tn, K_pad // tk),
        in_specs=in_specs,
        out_specs=pl.BlockSpec((tm, tn), lambda i, j, k: (i, j)),
        scratch_shapes=[pltpu.VMEM((tm, tn), jnp.float32)],
        compiler_params=pltpu.CompilerParams(
            dimension_semantics=("parallel", "parallel", "arbitrary"),
            vmem_limit_bytes=32 * 1024 * 1024),
    )(*args)

    return out[:M, :cout].reshape(n, ho, wo, cout)


def conv2d(x, p, stride=1, dilation=1, padding=0, relu=False, residual=None):
    """Conv (+ folded BN / bias) (+ fused residual add) (+ ReLU). x: NHWC (bf16)."""
    return _conv2d_impl(x, p["w2"], p["scale"], p["bias"], residual,
                        kh=p["kh"], kw=p["kw"], cout=p["cout"],
                        stride=stride, dilation=dilation, padding=padding,
                        relu=relu)


# ----------------------------------------------------------------------------
# Plain-JAX glue (pooling, bilinear resize)
# ----------------------------------------------------------------------------
def maxpool3x3s2(x):
    # TODO(synk): pooling kept in plain JAX (reduce_window); cold path, tiny tensor.
    return jax.lax.reduce_window(x, jnp.array(-jnp.inf, x.dtype), jax.lax.max,
                                 (1, 3, 3, 1), (1, 2, 2, 1),
                                 [(0, 0), (1, 1), (1, 1), (0, 0)])


@functools.partial(jax.jit, static_argnames=("oh", "ow"))
def bilinear_ac(x, oh, ow):
    """F.interpolate(mode='bilinear', align_corners=True) via separable matrices."""
    N, H, W, C = x.shape

    def interp_matrix(out, inp):
        if out == 1 or inp == 1:
            m = jnp.zeros((out, inp), jnp.float32)
            return m.at[:, 0].set(1.0)
        pos = jnp.arange(out, dtype=jnp.float32) * (inp - 1) / (out - 1)
        i0 = jnp.floor(pos).astype(jnp.int32)
        i1 = jnp.minimum(i0 + 1, inp - 1)
        d = pos - i0.astype(jnp.float32)
        rows = jnp.arange(out)
        m = jnp.zeros((out, inp), jnp.float32)
        m = m.at[rows, i0].add(1.0 - d)
        m = m.at[rows, i1].add(d)
        return m

    Rh = interp_matrix(oh, H)
    Rw = interp_matrix(ow, W)
    y = jnp.einsum("ah,nhwc->nawc", Rh, x.astype(jnp.float32))
    y = jnp.einsum("bw,nawc->nabc", Rw, y)
    return y.astype(x.dtype)


# ----------------------------------------------------------------------------
# Deterministic parameter generation (weights packed for the kernel at build time)
# ----------------------------------------------------------------------------
class ParamGen:
    def __init__(self, seed=0):
        self._key = jax.random.PRNGKey(seed)
        self._cnt = 0

    def _next(self):
        k = jax.random.fold_in(self._key, self._cnt)
        self._cnt += 1
        return k

    def _w(self, kh, kw, cin, cout):
        std = (2.0 / (kh * kw * cin)) ** 0.5  # kaiming_normal (fan_in)
        return jax.random.normal(self._next(), (kh, kw, cin, cout),
                                 jnp.float32) * std

    @staticmethod
    def _pack(w, scale, bias):
        kh, kw, cin, cout = w.shape
        K = kh * kw * cin
        _, K_pad = _pick_k_tiling(K)
        N_pad = _round_up(cout, 128)
        w2 = jnp.pad(w.reshape(K, cout).astype(jnp.bfloat16),
                     ((0, K_pad - K), (0, N_pad - cout)))
        s2 = jnp.pad(scale.reshape(1, cout).astype(jnp.float32),
                     ((0, 0), (0, N_pad - cout)))
        b2 = jnp.pad(bias.reshape(1, cout).astype(jnp.float32),
                     ((0, 0), (0, N_pad - cout)))
        return {"w2": w2, "scale": s2, "bias": b2,
                "kh": kh, "kw": kw, "cin": cin, "cout": cout}

    def conv_bn(self, kh, kw, cin, cout):
        # BN (eval): gamma=1, beta=0, running_mean=0, running_var=1.
        scale = jnp.full((cout,), 1.0 / (1.0 + BN_EPS) ** 0.5, jnp.float32)
        return self._pack(self._w(kh, kw, cin, cout),
                          scale, jnp.zeros((cout,), jnp.float32))

    def conv_bias(self, kh, kw, cin, cout):
        w = self._w(kh, kw, cin, cout)
        b = jax.random.normal(self._next(), (cout,), jnp.float32) * 0.01
        return self._pack(w, jnp.ones((cout,), jnp.float32), b)

    def conv_plain(self, kh, kw, cin, cout):
        return self._pack(self._w(kh, kw, cin, cout),
                          jnp.ones((cout,), jnp.float32),
                          jnp.zeros((cout,), jnp.float32))


# ----------------------------------------------------------------------------
# Model definition (parameters + forward)
# ----------------------------------------------------------------------------
def _make_bottleneck(pg, inplanes, planes, stride, dilation, downsample):
    return {
        "conv1": pg.conv_bn(1, 1, inplanes, planes),
        "conv2": pg.conv_bn(3, 3, planes, planes),
        "conv3": pg.conv_bn(1, 1, planes, planes * 4),
        "downsample": pg.conv_bn(1, 1, inplanes, planes * 4) if downsample else None,
        "stride": stride, "dilation": dilation,
    }


def _bottleneck_fwd(x, p):
    out = conv2d(x, p["conv1"], relu=True)
    out = conv2d(out, p["conv2"], stride=p["stride"], dilation=p["dilation"],
                 padding=p["dilation"], relu=True)
    if p["downsample"] is not None:
        residual = conv2d(x, p["downsample"], stride=p["stride"], relu=False)
    else:
        residual = x
    # residual add + ReLU fused into the conv3 matmul epilogue.
    return conv2d(out, p["conv3"], relu=True, residual=residual)


def _make_layer(pg, inplanes, planes, blocks, stride, dilation):
    ds = (stride != 1) or (inplanes != planes * 4)
    layers = [_make_bottleneck(pg, inplanes, planes, stride, dilation, ds)]
    inplanes = planes * 4
    for _ in range(1, blocks):
        layers.append(_make_bottleneck(pg, inplanes, planes, 1, dilation, False))
    return layers, inplanes


def _make_mg_unit(pg, inplanes, planes, blocks, stride, dilation):
    ds = (stride != 1) or (inplanes != planes * 4)
    layers = [_make_bottleneck(pg, inplanes, planes, stride,
                               blocks[0] * dilation, ds)]
    inplanes = planes * 4
    for i in range(1, len(blocks)):
        layers.append(_make_bottleneck(pg, inplanes, planes, 1,
                                       blocks[i] * dilation, False))
    return layers, inplanes


def build_deeplab_res_jpu(output_stride=16, num_classes=4, seed=0):
    pg = ParamGen(seed)
    if output_stride == 16:
        strides, dilations = [1, 2, 2, 1], [1, 1, 1, 2]
    elif output_stride == 8:
        strides, dilations = [1, 2, 1, 1], [1, 1, 2, 4]
    else:
        strides, dilations = [1, 2, 2, 2], [1, 1, 1, 1]

    backbone = {"conv1": pg.conv_bn(7, 7, 3, 64)}
    inplanes = 64
    backbone["layer1"], inplanes = _make_layer(pg, inplanes, 64, 3, strides[0], dilations[0])
    backbone["layer2"], inplanes = _make_layer(pg, inplanes, 128, 4, strides[1], dilations[1])
    backbone["layer3"], inplanes = _make_layer(pg, inplanes, 256, 6, strides[2], dilations[2])
    backbone["layer4"], inplanes = _make_mg_unit(pg, inplanes, 512, [1, 2, 4],
                                                 strides[3], dilations[3])

    jpu = {"conv5": pg.conv_bn(3, 3, 2048, 512),
           "conv4": pg.conv_bn(3, 3, 1024, 512),
           "conv3": pg.conv_bn(3, 3, 512, 512)}

    aspp = {"preconv": pg.conv_bias(3, 3, 1536, 512),
            "aspp1": pg.conv_bn(3, 3, 512, 256),
            "aspp2": pg.conv_bn(3, 3, 512, 256),
            "aspp3": pg.conv_bn(3, 3, 512, 256),
            "aspp4": pg.conv_bn(3, 3, 512, 256),
            "conv1": pg.conv_plain(1, 1, 1024, 256)}

    decoder = {"conv1": pg.conv_bn(1, 1, 256, 48),
               "lc1": pg.conv_bn(3, 3, 304, 256),
               "lc2": pg.conv_bn(3, 3, 256, 256),
               "lc3": pg.conv_bias(1, 1, 256, num_classes)}

    return {"backbone": backbone, "jpu": jpu, "aspp": aspp, "decoder": decoder}


def _resnet_fwd(x, p):
    x = conv2d(x, p["conv1"], stride=2, padding=3, relu=True)
    feat1 = x
    x = maxpool3x3s2(x)
    for b in p["layer1"]:
        x = _bottleneck_fwd(x, b)
    feat2 = x
    for b in p["layer2"]:
        x = _bottleneck_fwd(x, b)
    feat3 = x
    for b in p["layer3"]:
        x = _bottleneck_fwd(x, b)
    feat4 = x
    for b in p["layer4"]:
        x = _bottleneck_fwd(x, b)
    feat5 = x
    return feat1, feat2, feat3, feat4, feat5


def _jpu_fwd(feat3, feat4, feat5, p):
    f3 = conv2d(feat3, p["conv3"], padding=1, relu=True)
    f4 = conv2d(feat4, p["conv4"], padding=1, relu=True)
    f5 = conv2d(feat5, p["conv5"], padding=1, relu=True)
    H, W = f3.shape[1], f3.shape[2]
    f4 = bilinear_ac(f4, H, W)
    f5 = bilinear_ac(f5, H, W)
    return jnp.concatenate([f5, f4, f3], axis=-1)


def _aspp_fwd(x, p):
    x = conv2d(x, p["preconv"], padding=1, relu=False)
    x1 = conv2d(x, p["aspp1"], padding=1, dilation=1, relu=True)
    x2 = conv2d(x, p["aspp2"], padding=2, dilation=2, relu=True)
    x3 = conv2d(x, p["aspp3"], padding=4, dilation=4, relu=True)
    x4 = conv2d(x, p["aspp4"], padding=8, dilation=8, relu=True)
    x = jnp.concatenate([x1, x2, x3, x4], axis=-1)
    return conv2d(x, p["conv1"], relu=False)


def _decoder_fwd(x, low, p):
    low = conv2d(low, p["conv1"], relu=True)
    x = bilinear_ac(x, low.shape[1], low.shape[2])
    x = jnp.concatenate([x, low], axis=-1)
    x = conv2d(x, p["lc1"], padding=1, relu=True)   # Dropout(0.5): identity (eval)
    x = conv2d(x, p["lc2"], padding=1, relu=True)   # Dropout(0.1): identity (eval)
    x = conv2d(x, p["lc3"], relu=False)
    return x


def deeplab_res_jpu_forward(x_nchw, params):
    # NCHW -> NHWC; all activations run in bf16 (f32 accumulation inside the kernel).
    x = jnp.transpose(x_nchw, (0, 2, 3, 1)).astype(jnp.bfloat16)
    _, feat2, feat3, feat4, feat5 = _resnet_fwd(x, params["backbone"])
    y = _jpu_fwd(feat3, feat4, feat5, params["jpu"])
    y = _aspp_fwd(y, params["aspp"])
    y = _decoder_fwd(y, feat2, params["decoder"])
    y = bilinear_ac(y, x.shape[1], x.shape[2])
    return jnp.transpose(y, (0, 3, 1, 2)).astype(jnp.float32)  # NHWC -> NCHW


# ----------------------------------------------------------------------------
if __name__ == "__main__":
    key = jax.random.PRNGKey(0)
    x = jax.random.normal(key, (2, 3, 64, 64), jnp.float32)  # NCHW, like PyTorch

    params = build_deeplab_res_jpu(output_stride=16, num_classes=4, seed=0)
    out = deeplab_res_jpu_forward(x, params)
    out = jax.block_until_ready(out)

    assert out.shape == (2, 4, 64, 64), out.shape
    assert bool(jnp.all(jnp.isfinite(out)))
    print("KERNEL_OK")
</pallas_src>

<mosaic_0001>
module attributes {stable_mosaic.version = 11 : i64} {
  func.func @_matmul_bn_act_kernel(%arg0: i32, %arg1: i32, %arg2: i32, %arg3: memref<512x256xbf16, #tpu.memory_space<vmem>>, %arg4: memref<256x128xbf16, #tpu.memory_space<vmem>>, %arg5: memref<1x128xf32, #tpu.memory_space<vmem>>, %arg6: memref<1x128xf32, #tpu.memory_space<vmem>>, %arg7: memref<512x128xbf16, #tpu.memory_space<vmem>>, %arg8: memref<512x128xf32, #tpu.memory_space<vmem>>) attributes {dimension_semantics = [#tpu.dimension_semantics<parallel>, #tpu.dimension_semantics<parallel>, #tpu.dimension_semantics<arbitrary>], iteration_bounds = array<i64: 4, 1, 1>, scalar_prefetch = 0 : i64, scratch_operands = 1 : i64, tpu.core_type = #tpu.core_type<tc>, window_params = [{transform_indices = @transform_0, window_bounds = array<i64: 512, 256>}, {transform_indices = @transform_1, window_bounds = array<i64: 256, 128>}, {transform_indices = @transform_2, window_bounds = array<i64: 1, 128>}, {transform_indices = @transform_3, window_bounds = array<i64: 1, 128>}, {transform_indices = @transform_4, window_bounds = array<i64: 512, 128>}]} {
    %c0 = arith.constant 0 : index
    %c0_0 = arith.constant 0 : index
    %0 = vector.load %arg3[%c0, %c0_0] : memref<512x256xbf16, #tpu.memory_space<vmem>>, vector<512x256xbf16>
    %c0_1 = arith.constant 0 : index
    %c0_2 = arith.constant 0 : index
    %1 = vector.load %arg4[%c0_1, %c0_2] : memref<256x128xbf16, #tpu.memory_space<vmem>>, vector<256x128xbf16>
    %cst = arith.constant dense<0.000000e+00> : vector<512x128xf32>
    %2 = tpu.matmul %0, %1, %cst {dimension_numbers = #tpu.dot_dimension_numbers<[1], [0], [0], [1], [0, 0, 1, 1], [], []>} : vector<512x256xbf16>, vector<256x128xbf16>, vector<512x128xf32> -> vector<512x128xf32>
    %c0_i32 = arith.constant 0 : i32
    %3 = arith.cmpi eq, %arg2, %c0_i32 : i32
    %4 = arith.extui %3 : i1 to i32
    %c0_i32_3 = arith.constant 0 : i32
    %5 = arith.cmpi ne, %4, %c0_i32_3 : i32
    scf.if %5 {
      %c0_8 = arith.constant 0 : index
      %c0_9 = arith.constant 0 : index
      %12 = vector.load %arg8[%c0_8, %c0_9] : memref<512x128xf32, #tpu.memory_space<vmem>>, vector<512x128xf32>
      tpu.vector_store %arg8[%c0_8, %c0_9], %2 {strides = array<i32>} : memref<512x128xf32, #tpu.memory_space<vmem>>, vector<512x128xf32>,
    } else {
    }
    %c0_i32_4 = arith.constant 0 : i32
    %6 = arith.cmpi sgt, %arg2, %c0_i32_4 : i32
    %7 = arith.extui %6 : i1 to i32
    %c0_i32_5 = arith.constant 0 : i32
    %8 = arith.cmpi ne, %7, %c0_i32_5 : i32
    scf.if %8 {
      %c0_8 = arith.constant 0 : index
      %c0_9 = arith.constant 0 : index
      %12 = vector.load %arg8[%c0_8, %c0_9] : memref<512x128xf32, #tpu.memory_space<vmem>>, vector<512x128xf32>
      %13 = arith.addf %12, %2 : vector<512x128xf32>
      %c0_10 = arith.constant 0 : index
      %c0_11 = arith.constant 0 : index
      %14 = vector.load %arg8[%c0_10, %c0_11] : memref<512x128xf32, #tpu.memory_space<vmem>>, vector<512x128xf32>
      tpu.vector_store %arg8[%c0_10, %c0_11], %13 {strides = array<i32>} : memref<512x128xf32, #tpu.memory_space<vmem>>, vector<512x128xf32>,
    } else {
    }
    %c0_i32_6 = arith.constant 0 : i32
    %9 = arith.cmpi eq, %arg2, %c0_i32_6 : i32
    %10 = arith.extui %9 : i1 to i32
    %c0_i32_7 = arith.constant 0 : i32
    %11 = arith.cmpi ne, %10, %c0_i32_7 : i32
    scf.if %11 {
      %c0_8 = arith.constant 0 : index
      %c0_9 = arith.constant 0 : index
      %12 = vector.load %arg8[%c0_8, %c0_9] : memref<512x128xf32, #tpu.memory_space<vmem>>, vector<512x128xf32>
      %c0_10 = arith.constant 0 : index
      %c0_11 = arith.constant 0 : index
      %13 = vector.load %arg5[%c0_10, %c0_11] : memref<1x128xf32, #tpu.memory_space<vmem>>, vector<1x128xf32>
      %14 = vector.broadcast %13 : vector<1x128xf32> to vector<512x128xf32>
      %15 = arith.mulf %12, %14 : vector<512x128xf32>
      %c0_12 = arith.constant 0 : index
      %c0_13 = arith.constant 0 : index
      %16 = vector.load %arg6[%c0_12, %c0_13] : memref<1x128xf32, #tpu.memory_space<vmem>>, vector<1x128xf32>
      %17 = vector.broadcast %16 : vector<1x128xf32> to vector<512x128xf32>
      %18 = arith.addf %15, %17 : vector<512x128xf32>
      %cst_14 = arith.constant 0.000000e+00 : f32
      %19 = vector.broadcast %cst_14 : f32 to vector<512x128xf32>
      %20 = arith.maximumf %18, %19 : vector<512x128xf32>
      %21 = arith.truncf %20 : vector<512x128xf32> to vector<512x128xbf16>
      %c0_15 = arith.constant 0 : index
      %c0_16 = arith.constant 0 : index
      %22 = vector.load %arg7[%c0_15, %c0_16] : memref<512x128xbf16, #tpu.memory_space<vmem>>, vector<512x128xbf16>
      tpu.vector_store %arg7[%c0_15, %c0_16], %21 {strides = array<i32>} : memref<512x128xbf16, #tpu.memory_space<vmem>>, vector<512x128xbf16>,
    } else {
    }
    return
  }
  func.func @transform_0(%arg0: i32, %arg1: i32, %arg2: i32) -> (i32, i32) {
    %c0_i32 = arith.constant 0 : i32
    return %arg0, %arg2 : i32, i32
  }
  func.func @transform_1(%arg0: i32, %arg1: i32, %arg2: i32) -> (i32, i32) {
    %c0_i32 = arith.constant 0 : i32
    return %arg2, %arg1 : i32, i32
  }
  func.func @transform_2(%arg0: i32, %arg1: i32, %arg2: i32) -> (i32, i32) {
    %c0_i32 = arith.constant 0 : i32
    %c0_i32_0 = arith.constant 0 : i32
    return %c0_i32, %arg1 : i32, i32
  }
  func.func @transform_3(%arg0: i32, %arg1: i32, %arg2: i32) -> (i32, i32) {
    %c0_i32 = arith.constant 0 : i32
    %c0_i32_0 = arith.constant 0 : i32
    return %c0_i32, %arg1 : i32, i32
  }
  func.func @transform_4(%arg0: i32, %arg1: i32, %arg2: i32) -> (i32, i32) {
    %c0_i32 = arith.constant 0 : i32
    return %arg0, %arg1 : i32, i32
  }
}

</mosaic_0001>

<bundles_post_ra>
// kernel: _conv2d_impl.1
= control target key start
LH: loop header
LB: loop body
LE: loop exit
PB: predicated region body
PF: predicated region fallthrough
CT: control target
= control target key end

     0   :  { %9 = vsyncpa [#allocation4], 0  ;;  %s3262_s0 = inlined_call_operand.vmem [shape: bf16[2048,256], index: 0, kind: input, shape index: {}]   ;;  %s3263_s1 = inlined_call_operand.vmem [shape: bf16[256,128], index: 1, kind: input, shape index: {}]   ;;  %s3264_s2 = inlined_call_operand.vmem [shape: f32[1,128], index: 2, kind: input, shape index: {}]   ;;  %s3265_s3 = inlined_call_operand.vmem [shape: f32[1,128], index: 3, kind: input, shape index: {}]   ;;  %s3266_s4 = inlined_call_operand.hbm [shape: bf16[2048,128], index: 4, kind: output, shape index: {}]  }
   0x1   :  { %11 = vsyncpa [#allocation4 + $0x1], 0  ;;  %s2826_s15 = smov 0   ;;  %s2828_s16 = smov 0  }
   0x2   :  { %s2830_s17 = smov 0   ;;  %s2832_s18 = smov 0  }
   0x3   :  { %s2834_s19 = smov 0   ;;  %s2836_s20 = smov 0  }
   0x4 LB: > { %s2097_s21 = sadd.s32 4294967295, %s2795_s20   ;;  %s2098_s22 = sadd.s32 4294967294, %s2795_s20   ;;  %s2795_s20 = sphi %s2836_s20, %s17_s20   ;;  %s2791_s19 = sphi %s2834_s19, %s3273_s19   ;;  %s2787_s18 = sphi %s2832_s18, %s3272_s18   ;;  %s2783_s17 = sphi %s2830_s17, %s3271_s17   ;;  %s2779_s16 = sphi %s2828_s16, %s3270_s16   ;;  %s2775_s15 = sphi %s2826_s15, %s3269_s15  }
   0x5   : > { %s36_s23 = sadd.s32 1, %s2791_s19  ;;  %s153_s24 = sadd.s32 1, %s2783_s17 }
   0x6   : > { %p38_p0 = scmp.ge.s32.totalorder %s36_s23, 4  ;;  %p163_p1 = scmp.ne.s32.totalorder %s2783_s17, %s2779_s16 }
   0x7   : > { %p164_p2 = scmp.eq.s32.totalorder %s2097_s21, 3  ;;  %p169_p3 = scmp.ne.s32.totalorder %s2779_s16, %s2775_s15 }
   0x8   : > { %s3275_s23 = smov (%p38_p0, %s36_s23), 0  ;;  %p170_p5 = scmp.eq.s32.totalorder %s2098_s22, 3 }
   0x9   : > { %p2866_p4 = por %p164_p2, %p163_p1  ;;  %s148_s26 = ssub.s32 %s2791_s19, %s3275_s23 }
   0xa   : > { %p2104_p6 = scmp.ge.s32.totalorder %s2795_s20, 1  ;;  %p151_p7 = scmp.eq.s32.totalorder %s148_s26, 0 }
   0xb   : > { %p2873_p8 = por %p170_p5, %p169_p3  ;;  %p227_p9 = scmp.lt.s32.totalorder %s2795_s20, 5 }
   0xc   : > { %s2879_s28 = scalar_select %p151_p7, %s2783_s17, %s153_s24  }
   0xd   : > { %p228_p10 = pnand %p2104_p6, %p227_p9 }
   0xe   : > { %s2106_s5 = sshll.u32 (!%p228_p10), %s2787_s18, 6  ;;  %s2325_s21 = sshll.u32 (!%p228_p10), %s2787_s18, 12 }
   0xf   : > { %231 = sbr.rel (%p228_p10) target bundleno = 424 (0x1a8), region = 36  ;;  %p274_p11 = scmp.lt.s32.totalorder (!%p228_p10), %s2106_s5, 255 }
  0x10   : > { %s3209_s30 = scalar_lea.hbm (!%p228_p10), %s3266_s4, %s2325_s21  ;;  %s2798_s6 = smov (!%p228_p10), [#allocation3]  }
  0x11   : > { %s2723_s7 = sshll.u32 (!%p228_p10), %s2798_s6, 4  ;;  %s2724_s7 = int_to_ptr.vmem [resolvable:$false] %s2723_s7 }
  0x12   : > { %s2725_s8 = scalar_lea.vmem (!%p228_p10), %s2724_s7, 8192 }
  0x14   : > { %v2607_v0 = vld [vmem:[%s3263_s1 + $0x38] sm:$0xff]   ;;  %v2797_v1 = vmov 0   ;;  %v2608_v2 = vld [vmem:[%s3263_s1 + $0x30] sm:$0xff]   ;;  %v2609_v3 = vld [vmem:[%s3263_s1 + $0x28] sm:$0xff]   ;;  %s3277_s5 = smov (!%p274_p11, %s2106_s5), 255 }
  0x15   : > { %813 = vmatprep.subr.bf16.mxu0 %v2797_v1  ;;  %2517 = vmatprep.subr.bf16.mxu1 %v2797_v1  ;;  %v2610_v4 = vld [vmem:[%s3263_s1 + $0x20] sm:$0xff]   ;;  %s2260_s12 = sshll.u32 %s3277_s5, 3  ;;  %v2611_v5 = vld [vmem:[%s3263_s1 + $0x18] sm:$0xff]   ;;  %v2612_v7 = vld [vmem:[%s3263_s1 + $0x10] sm:$0xff]  }
  0x16   : > { %814 = vmatpush1.bf16.msra.mxu0 %v2607_v0  ;;  %2533 = vmatpush1.bf16.msra.mxu1 %v2607_v0  ;;  %s2908_s24 = scalar_lea.vmem %s3262_s0, %s2260_s12  ;;  %v2613_v9 = vld [vmem:[%s3263_s1 + $0x8] sm:$0xff]   ;;  %v2614_v10 = vld [vmem:[%s3263_s1] sm:$0xff]   ;;  %v2615_v11 = vld [vmem:[%s3263_s1 + $0x78] sm:$0xff]  }
  0x17   : > { %815 = vmatprep.subr.bf16.mxu0 %v2797_v1  ;;  %2518 = vmatprep.subr.bf16.mxu1 %v2797_v1  ;;  %v2625_v6 = vld [vmem:[%s2908_s24 + $0x4] ss:$8 sps:$4 sm:$0xff]   ;;  %v2616_v12 = vld [vmem:[%s3263_s1 + $0x70] sm:$0xff]   ;;  %v2619_v15 = vld [vmem:[%s3263_s1 + $0x58] sm:$0xff]  }
  0x18   : > { %v2628_v8 = vld [vmem:[%s2908_s24 + $0x104] ss:$8 sps:$4 sm:$0xff]   ;;  %845 = vmatprep.mubr.bf16.mxu0 %v2625_v6  ;;  %v2620_v16 = vld [vmem:[%s3263_s1 + $0x50] sm:$0xff]   ;;  %v2623_v19 = vld [vmem:[%s2908_s24] ss:$8 sps:$4 sm:$0xff]  }
  0x19   : > { %973 = vmatprep.mubr.bf16.mxu1 %v2628_v8  ;;  %v2617_v13 = vld [vmem:[%s3263_s1 + $0x68] sm:$0xff]   ;;  %v2618_v14 = vld [vmem:[%s3263_s1 + $0x60] sm:$0xff]   ;;  %v2629_v21 = vld [vmem:[%s2908_s24 + $0x14] ss:$8 sps:$4 sm:$0xff]  }
  0x1a   : > { %816 = vmatpush1.bf16.msra.mxu0 %v2608_v2  ;;  %2534 = vmatpush1.bf16.msra.mxu1 %v2608_v2  ;;  %v2621_v17 = vld [vmem:[%s3263_s1 + $0x48] sm:$0xff]   ;;  %v2622_v18 = vld [vmem:[%s3263_s1 + $0x40] sm:$0xff]   ;;  %v2631_v22 = vld [vmem:[%s2908_s24 + $0x114] ss:$8 sps:$4 sm:$0xff]  }
  0x1b   : > { %817 = vmatprep.subr.bf16.mxu0 %v2797_v1  ;;  %2519 = vmatprep.subr.bf16.mxu1 %v2797_v1  ;;  %v2626_v20 = vld [vmem:[%s2908_s24 + $0x100] ss:$8 sps:$4 sm:$0xff]   ;;  %v2633_v23 = vld [vmem:[%s2908_s24 + $0x10] ss:$8 sps:$4 sm:$0xff]   ;;  %v2635_v25 = vld [vmem:[%s2908_s24 + $0x24] ss:$8 sps:$4 sm:$0xff]  }
  0x1c   : > { %v2634_v24 = vld [vmem:[%s2908_s24 + $0x110] ss:$8 sps:$4 sm:$0xff]   ;;  %v2637_v26 = vld [vmem:[%s2908_s24 + $0x124] ss:$8 sps:$4 sm:$0xff]   ;;  %v2639_v27 = vld [vmem:[%s2908_s24 + $0x20] ss:$8 sps:$4 sm:$0xff]  }
  0x1d   : > { %v2640_v28 = vld [vmem:[%s2908_s24 + $0x120] ss:$8 sps:$4 sm:$0xff]   ;;  %v2641_v29 = vld [vmem:[%s2908_s24 + $0x34] ss:$8 sps:$4 sm:$0xff]   ;;  %v2645_v31 = vld [vmem:[%s2908_s24 + $0x30] ss:$8 sps:$4 sm:$0xff]  }
  0x1e   : > { %818 = vmatpush1.bf16.msra.mxu0 %v2609_v3  ;;  %2535 = vmatpush1.bf16.msra.mxu1 %v2609_v3  ;;  %v2643_v30 = vld [vmem:[%s2908_s24 + $0x134] ss:$8 sps:$4 sm:$0xff]   ;;  %v2646_v32 = vld [vmem:[%s2908_s24 + $0x130] ss:$8 sps:$4 sm:$0xff]   ;;  %v2647_v33 = vld [vmem:[%s2908_s24 + $0x44] ss:$8 sps:$4 sm:$0xff]  }
  0x1f   : > { %819 = vmatprep.subr.bf16.mxu0 %v2797_v1  ;;  %2520 = vmatprep.subr.bf16.mxu1 %v2797_v1  ;;  %v2649_v34 = vld [vmem:[%s2908_s24 + $0x144] ss:$8 sps:$4 sm:$0xff]   ;;  %v2651_v35 = vld [vmem:[%s2908_s24 + $0x40] ss:$8 sps:$4 sm:$0xff]   ;;  %v2653_v37 = vld [vmem:[%s2908_s24 + $0x54] ss:$8 sps:$4 sm:$0xff]  }
  0x20   : > { %v2652_v36 = vld [vmem:[%s2908_s24 + $0x140] ss:$8 sps:$4 sm:$0xff]   ;;  %v2655_v38 = vld [vmem:[%s2908_s24 + $0x154] ss:$8 sps:$4 sm:$0xff]   ;;  %v2657_v39 = vld [vmem:[%s2908_s24 + $0x50] ss:$8 sps:$4 sm:$0xff]  }
  0x21   : > { %v2658_v40 = vld [vmem:[%s2908_s24 + $0x150] ss:$8 sps:$4 sm:$0xff]   ;;  %v2659_v41 = vld [vmem:[%s2908_s24 + $0x64] ss:$8 sps:$4 sm:$0xff]   ;;  %v2663_v43 = vld [vmem:[%s2908_s24 + $0x60] ss:$8 sps:$4 sm:$0xff]  }
  0x22   : > { %820 = vmatpush1.bf16.msra.mxu0 %v2610_v4  ;;  %2536 = vmatpush1.bf16.msra.mxu1 %v2610_v4  ;;  %v2661_v42 = vld [vmem:[%s2908_s24 + $0x164] ss:$8 sps:$4 sm:$0xff]   ;;  %v2664_v44 = vld [vmem:[%s2908_s24 + $0x160] ss:$8 sps:$4 sm:$0xff]   ;;  %v2665_v45 = vld [vmem:[%s2908_s24 + $0x74] ss:$8 sps:$4 sm:$0xff]  }
  0x23   : > { %821 = vmatprep.subr.bf16.mxu0 %v2797_v1  ;;  %2521 = vmatprep.subr.bf16.mxu1 %v2797_v1  ;;  %v2667_v46 = vld [vmem:[%s2908_s24 + $0x174] ss:$8 sps:$4 sm:$0xff]   ;;  %v2669_v47 = vld [vmem:[%s2908_s24 + $0x70] ss:$8 sps:$4 sm:$0xff]   ;;  %v2671_v49 = vld [vmem:[%s2908_s24 + $0x84] ss:$8 sps:$4 sm:$0xff]  }
  0x24   : > { %v2670_v48 = vld [vmem:[%s2908_s24 + $0x170] ss:$8 sps:$4 sm:$0xff]   ;;  %v2673_v50 = vld [vmem:[%s2908_s24 + $0x184] ss:$8 sps:$4 sm:$0xff]   ;;  %v2675_v51 = vld [vmem:[%s2908_s24 + $0x80] ss:$8 sps:$4 sm:$0xff]  }
  0x25   : > { %v2676_v52 = vld [vmem:[%s2908_s24 + $0x180] ss:$8 sps:$4 sm:$0xff]   ;;  %v2677_v53 = vld [vmem:[%s2908_s24 + $0x94] ss:$8 sps:$4 sm:$0xff]   ;;  %v2681_v55 = vld [vmem:[%s2908_s24 + $0x90] ss:$8 sps:$4 sm:$0xff]  }
  0x26   : > { %822 = vmatpush1.bf16.msra.mxu0 %v2611_v5  ;;  %2537 = vmatpush1.bf16.msra.mxu1 %v2611_v5  ;;  %v2679_v54 = vld [vmem:[%s2908_s24 + $0x194] ss:$8 sps:$4 sm:$0xff]   ;;  %v2682_v56 = vld [vmem:[%s2908_s24 + $0x190] ss:$8 sps:$4 sm:$0xff]   ;;  %v2683_v57 = vld [vmem:[%s2908_s24 + $0xa4] ss:$8 sps:$4 sm:$0xff]  }
  0x27   : > { %823 = vmatprep.subr.bf16.mxu0 %v2797_v1  ;;  %2522 = vmatprep.subr.bf16.mxu1 %v2797_v1  ;;  %v2685_v58 = vld [vmem:[%s2908_s24 + $0x1a4] ss:$8 sps:$4 sm:$0xff]   ;;  %v2687_v59 = vld [vmem:[%s2908_s24 + $0xa0] ss:$8 sps:$4 sm:$0xff]   ;;  %v2689_v61 = vld [vmem:[%s2908_s24 + $0xb4] ss:$8 sps:$4 sm:$0xff]  }
  0x28   : > { %v2688_v60 = vld [vmem:[%s2908_s24 + $0x1a0] ss:$8 sps:$4 sm:$0xff]   ;;  %v2691_v62 = vld [vmem:[%s2908_s24 + $0x1b4] ss:$8 sps:$4 sm:$0xff]   ;;  %v2693_v63 = vld [vmem:[%s2908_s24 + $0xb0] ss:$8 sps:$4 sm:$0xff]  }
  0x29   : > { %v2694_v0 = vld [vmem:[%s2908_s24 + $0x1b0] ss:$8 sps:$4 sm:$0xff]   ;;  %v2697_v2 = vld [vmem:[%s2908_s24 + $0x1c4] ss:$8 sps:$4 sm:$0xff]   ;;  %v2699_v3 = vld [vmem:[%s2908_s24 + $0xc0] ss:$8 sps:$4 sm:$0xff]  }
  0x2a   : > { %824 = vmatpush1.bf16.msra.mxu0 %v2612_v7  ;;  %2538 = vmatpush1.bf16.msra.mxu1 %v2612_v7  ;;  %v2700_v4 = vld [vmem:[%s2908_s24 + $0x1c0] ss:$8 sps:$4 sm:$0xff]   ;;  %v2701_v5 = vld [vmem:[%s2908_s24 + $0xd4] ss:$8 sps:$4 sm:$0xff]   ;;  %v2705_v7 = vld [vmem:[%s2908_s24 + $0xd0] ss:$8 sps:$4 sm:$0xff]  }
  0x2b   : > { %825 = vmatprep.subr.bf16.mxu0 %v2797_v1  ;;  %2523 = vmatprep.subr.bf16.mxu1 %v2797_v1  ;;  %v2703_v6 = vld [vmem:[%s2908_s24 + $0x1d4] ss:$8 sps:$4 sm:$0xff]   ;;  %v2706_v8 = vld [vmem:[%s2908_s24 + $0x1d0] ss:$8 sps:$4 sm:$0xff]  }
  0x2e   : > { %826 = vmatpush1.bf16.msra.mxu0 %v2613_v9  ;;  %2539 = vmatpush1.bf16.msra.mxu1 %v2613_v9  ;;  %v2707_v9 = vld [vmem:[%s2908_s24 + $0xe4] ss:$8 sps:$4 sm:$0xff]  }
  0x2f   : > { %827 = vmatprep.subr.bf16.mxu0 %v2797_v1  ;;  %2524 = vmatprep.subr.bf16.mxu1 %v2797_v1 }
  0x32   : > { %828 = vmatpush1.bf16.msra.mxu0 %v2614_v10  ;;  %2540 = vmatpush1.bf16.msra.mxu1 %v2614_v10  ;;  %v2709_v10 = vld [vmem:[%s2908_s24 + $0x1e4] ss:$8 sps:$4 sm:$0xff]  }
  0x33   : > { %829 = vmatprep.subr.bf16.mxu0 %v2797_v1  ;;  %2525 = vmatprep.subr.bf16.mxu1 %v2797_v1 }
  0x36   : > { %830 = vmatpush2.bf16.msra.mxu0 %v2615_v11  ;;  %2541 = vmatpush2.bf16.msra.mxu1 %v2615_v11  ;;  %v2711_v11 = vld [vmem:[%s2908_s24 + $0xe0] ss:$8 sps:$4 sm:$0xff]  }
  0x37   : > { %831 = vmatprep.subr.bf16.mxu0 %v2797_v1  ;;  %2526 = vmatprep.subr.bf16.mxu1 %v2797_v1 }
  0x3a   : > { %832 = vmatpush2.bf16.msra.mxu0 %v2616_v12  ;;  %2542 = vmatpush2.bf16.msra.mxu1 %v2616_v12  ;;  %v2712_v12 = vld [vmem:[%s2908_s24 + $0x1e0] ss:$8 sps:$4 sm:$0xff]  }
  0x3b   : > { %833 = vmatprep.subr.bf16.mxu0 %v2797_v1  ;;  %2527 = vmatprep.subr.bf16.mxu1 %v2797_v1 }
  0x3e   : > { %834 = vmatpush2.bf16.msra.mxu0 %v2617_v13  ;;  %2543 = vmatpush2.bf16.msra.mxu1 %v2617_v13  ;;  %v2713_v13 = vld [vmem:[%s2908_s24 + $0xf4] ss:$8 sps:$4 sm:$0xff]  }
  0x3f   : > { %835 = vmatprep.subr.bf16.mxu0 %v2797_v1  ;;  %2528 = vmatprep.subr.bf16.mxu1 %v2797_v1 }
  0x42   : > { %836 = vmatpush2.bf16.msra.mxu0 %v2618_v14  ;;  %2544 = vmatpush2.bf16.msra.mxu1 %v2618_v14  ;;  %v2715_v14 = vld [vmem:[%s2908_s24 + $0x1f4] ss:$8 sps:$4 sm:$0xff]  }
  0x43   : > { %837 = vmatprep.subr.bf16.mxu0 %v2797_v1  ;;  %2529 = vmatprep.subr.bf16.mxu1 %v2797_v1 }
  0x46   : > { %838 = vmatpush2.bf16.msra.mxu0 %v2619_v15  ;;  %2545 = vmatpush2.bf16.msra.mxu1 %v2619_v15  ;;  %v2717_v15 = vld [vmem:[%s2908_s24 + $0xf0] ss:$8 sps:$4 sm:$0xff]  }
  0x47   : > { %839 = vmatprep.subr.bf16.mxu0 %v2797_v1  ;;  %2530 = vmatprep.subr.bf16.mxu1 %v2797_v1 }
  0x4a   : > { %840 = vmatpush2.bf16.msra.mxu0 %v2620_v16  ;;  %2546 = vmatpush2.bf16.msra.mxu1 %v2620_v16  ;;  %v2718_v16 = vld [vmem:[%s2908_s24 + $0x1f0] ss:$8 sps:$4 sm:$0xff]  }
  0x4b   : > { %841 = vmatprep.subr.bf16.mxu0 %v2797_v1  ;;  %2531 = vmatprep.subr.bf16.mxu1 %v2797_v1 }
  0x4e   : > { %842 = vmatpush2.bf16.msra.mxu0 %v2621_v17  ;;  %2547 = vmatpush2.bf16.msra.mxu1 %v2621_v17  ;;  %v3034_v17 = vld [vmem:[%s3264_s2] ss:$0 sm:$0xff] }
  0x4f   : > { %843 = vmatprep.subr.bf16.mxu0 %v2797_v1  ;;  %2532 = vmatprep.subr.bf16.mxu1 %v2797_v1  ;;  %v2695_v1 = vld [vmem:[%s2908_s24 + $0xc4] ss:$8 sps:$4 sm:$0xff]   ;;  %s269_s24 = sand.u32 1, %s2779_s16  }
  0x50   : > { %s2105_s13 = sshll.u32 %s269_s24, 8  ;;  %s3217_s18 = scalar_lea.sflag [#allocation4], %s269_s24 }
  0x51   : > { %s3056_s14 = scalar_lea.vmem [#allocation3], %s2105_s13 }
  0x52   : > { %844 = vmatpush2.bf16.msra.mxu0 %v2622_v18  ;;  %2548 = vmatpush2.bf16.msra.mxu1 %v2622_v18  ;;  %s1974_s22 = sshll.u32 %s3056_s14, 4  ;;  %s3211_s22 = int_to_ptr.vmem [resolvable:$true] %s1974_s22 }
  0x53   : > { %s2719_s5 = scalar_lea.vmem %s3211_s22, 4096  ;;  %p2726_p1 = scmp.lt.s32.totalorder %s3211_s22, %s2724_s7 }
  0x54   : > { %p2720_p12 = scmp.ne.s32.totalorder %s3211_s22, %s2719_s5  ;;  %p2727_p2 = scmp.lt.s32.totalorder %s2725_s8, %s2719_s5 }
  0x55   : > { %846 = vmatmul.mubr.bf16.vlgmr.msra.gmra.mxu0 %v2623_v19  ;;  %974 = vmatmul.mubr.bf16.vlgmr.msra.gmra.mxu1 %v2626_v20 }
  0x56   : > { %853 = vmatprep.mubr.bf16.mxu0 %v2629_v21  ;;  %981 = vmatprep.mubr.bf16.mxu1 %v2631_v22  ;;  %v3040_v21 = vld [vmem:[%s3265_s3] ss:$0 sm:$0xff]  ;;  %p2721_p13 = pnand %p2720_p12, %p2866_p4  ;;  %p2728_p3 = por %p2727_p2, %p2726_p1 }
  0x58   : > { %p2722_p0 = pneg %p2721_p13 }
  0x5a   : > { %p2729_p5 = pnand %p2728_p3, %p2722_p0 }
  0x5d   : > { %854 = vmatmul.mubr.bf16.gmra.mxu0 %v2633_v23  ;;  %982 = vmatmul.mubr.bf16.gmra.mxu1 %v2634_v24 }
  0x5e   : > { %861 = vmatprep.mubr.bf16.mxu0 %v2635_v25  ;;  %989 = vmatprep.mubr.bf16.mxu1 %v2637_v26 }
  0x65   : > { %862 = vmatmul.mubr.bf16.gmra.mxu0 %v2639_v27  ;;  %990 = vmatmul.mubr.bf16.gmra.mxu1 %v2640_v28 }
  0x66   : > { %869 = vmatprep.mubr.bf16.mxu0 %v2641_v29  ;;  %997 = vmatprep.mubr.bf16.mxu1 %v2643_v30 }
  0x6d   : > { %870 = vmatmul.mubr.bf16.gmra.mxu0 %v2645_v31  ;;  %998 = vmatmul.mubr.bf16.gmra.mxu1 %v2646_v32 }
  0x6e   : > { %877 = vmatprep.mubr.bf16.mxu0 %v2647_v33  ;;  %1005 = vmatprep.mubr.bf16.mxu1 %v2649_v34 }
  0x75   : > { %878 = vmatmul.mubr.bf16.gmra.mxu0 %v2651_v35  ;;  %1006 = vmatmul.mubr.bf16.gmra.mxu1 %v2652_v36 }
  0x76   : > { %885 = vmatprep.mubr.bf16.mxu0 %v2653_v37  ;;  %1013 = vmatprep.mubr.bf16.mxu1 %v2655_v38 }
  0x7d   : > { %886 = vmatmul.mubr.bf16.gmra.mxu0 %v2657_v39  ;;  %1014 = vmatmul.mubr.bf16.gmra.mxu1 %v2658_v40 }
  0x7e   : > { %893 = vmatprep.mubr.bf16.mxu0 %v2659_v41  ;;  %1021 = vmatprep.mubr.bf16.mxu1 %v2661_v42 }
  0x85   : > { %894 = vmatmul.mubr.bf16.gmra.mxu0 %v2663_v43  ;;  %1022 = vmatmul.mubr.bf16.gmra.mxu1 %v2664_v44 }
  0x86   : > { %901 = vmatprep.mubr.bf16.mxu0 %v2665_v45  ;;  %1029 = vmatprep.mubr.bf16.mxu1 %v2667_v46 }
  0x8d   : > { %902 = vmatmul.mubr.bf16.gmra.mxu0 %v2669_v47  ;;  %1030 = vmatmul.mubr.bf16.gmra.mxu1 %v2670_v48 }
  0x8e   : > { %909 = vmatprep.mubr.bf16.mxu0 %v2671_v49  ;;  %1037 = vmatprep.mubr.bf16.mxu1 %v2673_v50 }
  0x95   : > { %910 = vmatmul.mubr.bf16.gmra.mxu0 %v2675_v51  ;;  %1038 = vmatmul.mubr.bf16.gmra.mxu1 %v2676_v52 }
  0x96   : > { %917 = vmatprep.mubr.bf16.mxu0 %v2677_v53  ;;  %1045 = vmatprep.mubr.bf16.mxu1 %v2679_v54 }
  0x9d   : > { %918 = vmatmul.mubr.bf16.gmra.mxu0 %v2681_v55  ;;  %1046 = vmatmul.mubr.bf16.gmra.mxu1 %v2682_v56 }
  0x9e   : > { %925 = vmatprep.mubr.bf16.mxu0 %v2683_v57  ;;  %1053 = vmatprep.mubr.bf16.mxu1 %v2685_v58 }
  0xa5   : > { %926 = vmatmul.mubr.bf16.gmra.mxu0 %v2687_v59  ;;  %1054 = vmatmul.mubr.bf16.gmra.mxu1 %v2688_v60 }
  0xa6   : > { %933 = vmatprep.mubr.bf16.mxu0 %v2689_v61  ;;  %1061 = vmatprep.mubr.bf16.mxu1 %v2691_v62 }
  0xad   : > { %934 = vmatmul.mubr.bf16.gmra.mxu0 %v2693_v63  ;;  %1062 = vmatmul.mubr.bf16.gmra.mxu1 %v2694_v0 }
  0xae   : > { %941 = vmatprep.mubr.bf16.mxu0 %v2695_v1  ;;  %1069 = vmatprep.mubr.bf16.mxu1 %v2697_v2 }
  0xb5   : > { %942 = vmatmul.mubr.bf16.gmra.mxu0 %v2699_v3  ;;  %1070 = vmatmul.mubr.bf16.gmra.mxu1 %v2700_v4 }
  0xb6   : > { %949 = vmatprep.mubr.bf16.mxu0 %v2701_v5  ;;  %1077 = vmatprep.mubr.bf16.mxu1 %v2703_v6 }
  0xbd   : > { %950 = vmatmul.mubr.bf16.gmra.mxu0 %v2705_v7  ;;  %1078 = vmatmul.mubr.bf16.gmra.mxu1 %v2706_v8 }
  0xbe   : > { %957 = vmatprep.mubr.bf16.mxu0 %v2707_v9  ;;  %1085 = vmatprep.mubr.bf16.mxu1 %v2709_v10 }
  0xc5   : > { %958 = vmatmul.mubr.bf16.gmra.mxu0 %v2711_v11  ;;  %1086 = vmatmul.mubr.bf16.gmra.mxu1 %v2712_v12 }
  0xc6   : > { %965 = vmatprep.mubr.bf16.mxu0 %v2713_v13  ;;  %1093 = vmatprep.mubr.bf16.mxu1 %v2715_v14 }
  0xcd   : > { %966 = vmatmul.mubr.bf16.gmra.mxu0 %v2717_v15  ;;  %1094 = vmatmul.mubr.bf16.gmra.mxu1 %v2718_v16 }
 0x115   : > { %v847_v18 = vpop.f32.mrf.mxu0  ;;  %v975_v19 = vpop.f32.mrf.mxu1 }
 0x116   : > { %v1440_v20 = vmul.f32 %v3034_v17, %v847_v18  ;;  %v1472_v22 = vmul.f32 %v3034_v17, %v975_v19 }
 0x117   : > { %v849_v23 = vpop.f32.mrf.mxu0  ;;  %v977_v24 = vpop.f32.mrf.mxu1 }
 0x118   : > { %v1511_v25 = vadd.f32 %v3040_v21, %v1440_v20  ;;  %v1543_v26 = vadd.f32 %v3040_v21, %v1472_v22 }
 0x119   : > { %v850_v27 = vpop.f32.mrf.mxu0  ;;  %v978_v28 = vpop.f32.mrf.mxu1 }
 0x11a   : > { %v1441_v29 = vmul.f32 %v3034_v17, %v850_v27  ;;  %v1473_v30 = vmul.f32 %v3034_v17, %v978_v28  ;;  %v1575_v35 = vmax.f32 %v1511_v25, 0.0  ;;  %v1607_v36 = vmax.f32 %v1543_v26, 0.0 }
 0x11b   : > { %v852_v31 = vpop.f32.mrf.mxu0  ;;  %v980_v32 = vpop.f32.mrf.mxu1 }
 0x11c   : > { %v1512_v33 = vadd.f32 %v3040_v21, %v1441_v29  ;;  %v1544_v34 = vadd.f32 %v3040_v21, %v1473_v30 }
 0x11d   : > { %v855_v37 = vpop.f32.mrf.mxu0  ;;  %v983_v38 = vpop.f32.mrf.mxu1 }
 0x11e   : > { %v1576_v39 = vmax.f32 %v1512_v33, 0.0  ;;  %v1608_v40 = vmax.f32 %v1544_v34, 0.0  ;;  %v1442_v41 = vmul.f32 %v3034_v17, %v855_v37  ;;  %v1474_v42 = vmul.f32 %v3034_v17, %v983_v38 }
 0x11f   : > { %v857_v43 = vpop.f32.mrf.mxu0  ;;  %v985_v44 = vpop.f32.mrf.mxu1 }
 0x120   : > { %v2329_v45 = vpack.c.bf16 %v1576_v39, %v1575_v35  ;;  %v2409_v46 = vpack.c.bf16 %v1608_v40, %v1607_v36  ;;  %v1513_v47 = vadd.f32 %v3040_v21, %v1442_v41  ;;  %v1545_v48 = vadd.f32 %v3040_v21, %v1474_v42 }
 0x121   : > { %v858_v49 = vpop.f32.mrf.mxu0  ;;  %v986_v50 = vpop.f32.mrf.mxu1 }
 0x122   : > { %2330 = vst [vmem:[%s3056_s14] sm:$0xff] %v2329_v45   ;;  %2501 = vst [vmem:[%s3056_s14 + $0x80] sm:$0xff] %v2409_v46   ;;  %v1443_v51 = vmul.f32 %v3034_v17, %v858_v49  ;;  %v1475_v52 = vmul.f32 %v3034_v17, %v986_v50  ;;  %v1577_v57 = vmax.f32 %v1513_v47, 0.0  ;;  %v1609_v58 = vmax.f32 %v1545_v48, 0.0 }
 0x123   : > { %v860_v53 = vpop.f32.mrf.mxu0  ;;  %v988_v54 = vpop.f32.mrf.mxu1 }
 0x124   : > { %v1514_v55 = vadd.f32 %v3040_v21, %v1443_v51  ;;  %v1546_v56 = vadd.f32 %v3040_v21, %v1475_v52 }
 0x125   : > { %v863_v59 = vpop.f32.mrf.mxu0  ;;  %v991_v60 = vpop.f32.mrf.mxu1 }
 0x126   : > { %v1578_v61 = vmax.f32 %v1514_v55, 0.0  ;;  %v1610_v62 = vmax.f32 %v1546_v56, 0.0  ;;  %v1444_v63 = vmul.f32 %v3034_v17, %v863_v59  ;;  %v1476_v0 = vmul.f32 %v3034_v17, %v991_v60 }
 0x127   : > { %v865_v1 = vpop.f32.mrf.mxu0  ;;  %v993_v2 = vpop.f32.mrf.mxu1 }
 0x128   : > { %v2334_v3 = vpack.c.bf16 %v1578_v61, %v1577_v57  ;;  %v2414_v4 = vpack.c.bf16 %v1610_v62, %v1609_v58  ;;  %v1515_v5 = vadd.f32 %v3040_v21, %v1444_v63  ;;  %v1547_v6 = vadd.f32 %v3040_v21, %v1476_v0 }
 0x129   : > { %v866_v7 = vpop.f32.mrf.mxu0  ;;  %v994_v8 = vpop.f32.mrf.mxu1 }
 0x12a   : > { %2486 = vst [vmem:[%s3056_s14 + $0x8] sm:$0xff] %v2334_v3   ;;  %2502 = vst [vmem:[%s3056_s14 + $0x88] sm:$0xff] %v2414_v4   ;;  %v1445_v9 = vmul.f32 %v3034_v17, %v866_v7  ;;  %v1477_v10 = vmul.f32 %v3034_v17, %v994_v8  ;;  %v1579_v15 = vmax.f32 %v1515_v5, 0.0  ;;  %v1611_v16 = vmax.f32 %v1547_v6, 0.0 }
 0x12b   : > { %v868_v11 = vpop.f32.mrf.mxu0  ;;  %v996_v12 = vpop.f32.mrf.mxu1 }
 0x12c   : > { %v1516_v13 = vadd.f32 %v3040_v21, %v1445_v9  ;;  %v1548_v14 = vadd.f32 %v3040_v21, %v1477_v10 }
 0x12d   : > { %v871_v18 = vpop.f32.mrf.mxu0  ;;  %v999_v19 = vpop.f32.mrf.mxu1 }
 0x12e   : > { %v1580_v20 = vmax.f32 %v1516_v13, 0.0  ;;  %v1612_v22 = vmax.f32 %v1548_v14, 0.0  ;;  %v1446_v23 = vmul.f32 %v3034_v17, %v871_v18  ;;  %v1478_v24 = vmul.f32 %v3034_v17, %v999_v19 }
 0x12f   : > { %v873_v25 = vpop.f32.mrf.mxu0  ;;  %v1001_v26 = vpop.f32.mrf.mxu1 }
 0x130   : > { %v2339_v27 = vpack.c.bf16 %v1580_v20, %v1579_v15  ;;  %v2419_v28 = vpack.c.bf16 %v1612_v22, %v1611_v16  ;;  %v1517_v29 = vadd.f32 %v3040_v21, %v1446_v23  ;;  %v1549_v30 = vadd.f32 %v3040_v21, %v1478_v24 }
 0x131   : > { %v874_v31 = vpop.f32.mrf.mxu0  ;;  %v1002_v32 = vpop.f32.mrf.mxu1 }
 0x132   : > { %2487 = vst [vmem:[%s3056_s14 + $0x10] sm:$0xff] %v2339_v27   ;;  %2503 = vst [vmem:[%s3056_s14 + $0x90] sm:$0xff] %v2419_v28   ;;  %v1447_v33 = vmul.f32 %v3034_v17, %v874_v31  ;;  %v1479_v34 = vmul.f32 %v3034_v17, %v1002_v32  ;;  %v1581_v39 = vmax.f32 %v1517_v29, 0.0  ;;  %v1613_v40 = vmax.f32 %v1549_v30, 0.0 }
 0x133   : > { %v876_v35 = vpop.f32.mrf.mxu0  ;;  %v1004_v36 = vpop.f32.mrf.mxu1 }
 0x134   : > { %v1518_v37 = vadd.f32 %v3040_v21, %v1447_v33  ;;  %v1550_v38 = vadd.f32 %v3040_v21, %v1479_v34 }
 0x135   : > { %v879_v41 = vpop.f32.mrf.mxu0  ;;  %v1007_v42 = vpop.f32.mrf.mxu1 }
 0x136   : > { %v1582_v43 = vmax.f32 %v1518_v37, 0.0  ;;  %v1614_v44 = vmax.f32 %v1550_v38, 0.0  ;;  %v1448_v45 = vmul.f32 %v3034_v17, %v879_v41  ;;  %v1480_v46 = vmul.f32 %v3034_v17, %v1007_v42 }
 0x137   : > { %v881_v47 = vpop.f32.mrf.mxu0  ;;  %v1009_v48 = vpop.f32.mrf.mxu1 }
 0x138   : > { %v2344_v49 = vpack.c.bf16 %v1582_v43, %v1581_v39  ;;  %v2424_v50 = vpack.c.bf16 %v1614_v44, %v1613_v40  ;;  %v1519_v51 = vadd.f32 %v3040_v21, %v1448_v45  ;;  %v1551_v52 = vadd.f32 %v3040_v21, %v1480_v46 }
 0x139   : > { %v882_v53 = vpop.f32.mrf.mxu0  ;;  %v1010_v54 = vpop.f32.mrf.mxu1 }
 0x13a   : > { %2488 = vst [vmem:[%s3056_s14 + $0x18] sm:$0xff] %v2344_v49   ;;  %2504 = vst [vmem:[%s3056_s14 + $0x98] sm:$0xff] %v2424_v50   ;;  %v1449_v55 = vmul.f32 %v3034_v17, %v882_v53  ;;  %v1481_v56 = vmul.f32 %v3034_v17, %v1010_v54  ;;  %v1583_v61 = vmax.f32 %v1519_v51, 0.0  ;;  %v1615_v62 = vmax.f32 %v1551_v52, 0.0 }
 0x13b   : > { %v884_v57 = vpop.f32.mrf.mxu0  ;;  %v1012_v58 = vpop.f32.mrf.mxu1 }
 0x13c   : > { %v1520_v59 = vadd.f32 %v3040_v21, %v1449_v55  ;;  %v1552_v60 = vadd.f32 %v3040_v21, %v1481_v56 }
 0x13d   : > { %v887_v63 = vpop.f32.mrf.mxu0  ;;  %v1015_v0 = vpop.f32.mrf.mxu1 }
 0x13e   : > { %v1584_v1 = vmax.f32 %v1520_v59, 0.0  ;;  %v1616_v2 = vmax.f32 %v1552_v60, 0.0  ;;  %v1450_v3 = vmul.f32 %v3034_v17, %v887_v63  ;;  %v1482_v4 = vmul.f32 %v3034_v17, %v1015_v0 }
 0x13f   : > { %v889_v5 = vpop.f32.mrf.mxu0  ;;  %v1017_v6 = vpop.f32.mrf.mxu1 }
 0x140   : > { %v2349_v7 = vpack.c.bf16 %v1584_v1, %v1583_v61  ;;  %v2429_v8 = vpack.c.bf16 %v1616_v2, %v1615_v62  ;;  %v1521_v9 = vadd.f32 %v3040_v21, %v1450_v3  ;;  %v1553_v10 = vadd.f32 %v3040_v21, %v1482_v4 }
 0x141   : > { %v890_v11 = vpop.f32.mrf.mxu0  ;;  %v1018_v12 = vpop.f32.mrf.mxu1 }
 0x142   : > { %2489 = vst [vmem:[%s3056_s14 + $0x20] sm:$0xff] %v2349_v7   ;;  %2505 = vst [vmem:[%s3056_s14 + $0xa0] sm:$0xff] %v2429_v8   ;;  %v1451_v13 = vmul.f32 %v3034_v17, %v890_v11  ;;  %v1483_v14 = vmul.f32 %v3034_v17, %v1018_v12  ;;  %v1585_v20 = vmax.f32 %v1521_v9, 0.0  ;;  %v1617_v22 = vmax.f32 %v1553_v10, 0.0 }
 0x143   : > { %v892_v15 = vpop.f32.mrf.mxu0  ;;  %v1020_v16 = vpop.f32.mrf.mxu1 }
 0x144   : > { %v1522_v18 = vadd.f32 %v3040_v21, %v1451_v13  ;;  %v1554_v19 = vadd.f32 %v3040_v21, %v1483_v14 }
 0x145   : > { %v895_v23 = vpop.f32.mrf.mxu0  ;;  %v1023_v24 = vpop.f32.mrf.mxu1 }
 0x146   : > { %v1586_v25 = vmax.f32 %v1522_v18, 0.0  ;;  %v1618_v26 = vmax.f32 %v1554_v19, 0.0  ;;  %v1452_v27 = vmul.f32 %v3034_v17, %v895_v23  ;;  %v1484_v28 = vmul.f32 %v3034_v17, %v1023_v24 }
 0x147   : > { %v897_v29 = vpop.f32.mrf.mxu0  ;;  %v1025_v30 = vpop.f32.mrf.mxu1 }
 0x148   : > { %v2354_v31 = vpack.c.bf16 %v1586_v25, %v1585_v20  ;;  %v2434_v32 = vpack.c.bf16 %v1618_v26, %v1617_v22  ;;  %v1523_v33 = vadd.f32 %v3040_v21, %v1452_v27  ;;  %v1555_v34 = vadd.f32 %v3040_v21, %v1484_v28 }
 0x149   : > { %v898_v35 = vpop.f32.mrf.mxu0  ;;  %v1026_v36 = vpop.f32.mrf.mxu1 }
 0x14a   : > { %2490 = vst [vmem:[%s3056_s14 + $0x28] sm:$0xff] %v2354_v31   ;;  %2506 = vst [vmem:[%s3056_s14 + $0xa8] sm:$0xff] %v2434_v32   ;;  %v1453_v37 = vmul.f32 %v3034_v17, %v898_v35  ;;  %v1485_v38 = vmul.f32 %v3034_v17, %v1026_v36  ;;  %v1587_v43 = vmax.f32 %v1523_v33, 0.0  ;;  %v1619_v44 = vmax.f32 %v1555_v34, 0.0 }
 0x14b   : > { %v900_v39 = vpop.f32.mrf.mxu0  ;;  %v1028_v40 = vpop.f32.mrf.mxu1 }
 0x14c   : > { %v1524_v41 = vadd.f32 %v3040_v21, %v1453_v37  ;;  %v1556_v42 = vadd.f32 %v3040_v21, %v1485_v38 }
 0x14d   : > { %v903_v45 = vpop.f32.mrf.mxu0  ;;  %v1031_v46 = vpop.f32.mrf.mxu1 }
 0x14e   : > { %v1588_v47 = vmax.f32 %v1524_v41, 0.0  ;;  %v1620_v48 = vmax.f32 %v1556_v42, 0.0  ;;  %v1454_v49 = vmul.f32 %v3034_v17, %v903_v45  ;;  %v1486_v50 = vmul.f32 %v3034_v17, %v1031_v46 }
 0x14f   : > { %v905_v51 = vpop.f32.mrf.mxu0  ;;  %v1033_v52 = vpop.f32.mrf.mxu1 }
 0x150   : > { %v2359_v53 = vpack.c.bf16 %v1588_v47, %v1587_v43  ;;  %v2439_v54 = vpack.c.bf16 %v1620_v48, %v1619_v44  ;;  %v1525_v55 = vadd.f32 %v3040_v21, %v1454_v49  ;;  %v1557_v56 = vadd.f32 %v3040_v21, %v1486_v50 }
 0x151   : > { %v906_v57 = vpop.f32.mrf.mxu0  ;;  %v1034_v58 = vpop.f32.mrf.mxu1 }
 0x152   : > { %2491 = vst [vmem:[%s3056_s14 + $0x30] sm:$0xff] %v2359_v53   ;;  %2507 = vst [vmem:[%s3056_s14 + $0xb0] sm:$0xff] %v2439_v54   ;;  %v1455_v59 = vmul.f32 %v3034_v17, %v906_v57  ;;  %v1487_v60 = vmul.f32 %v3034_v17, %v1034_v58  ;;  %v1589_v1 = vmax.f32 %v1525_v55, 0.0  ;;  %v1621_v2 = vmax.f32 %v1557_v56, 0.0 }
 0x153   : > { %v908_v61 = vpop.f32.mrf.mxu0  ;;  %v1036_v62 = vpop.f32.mrf.mxu1 }
 0x154   : > { %v1526_v63 = vadd.f32 %v3040_v21, %v1455_v59  ;;  %v1558_v0 = vadd.f32 %v3040_v21, %v1487_v60 }
 0x155   : > { %v911_v3 = vpop.f32.mrf.mxu0  ;;  %v1039_v4 = vpop.f32.mrf.mxu1 }
 0x156   : > { %v1590_v5 = vmax.f32 %v1526_v63, 0.0  ;;  %v1622_v6 = vmax.f32 %v1558_v0, 0.0  ;;  %v1456_v7 = vmul.f32 %v3034_v17, %v911_v3  ;;  %v1488_v8 = vmul.f32 %v3034_v17, %v1039_v4 }
 0x157   : > { %v913_v9 = vpop.f32.mrf.mxu0  ;;  %v1041_v10 = vpop.f32.mrf.mxu1 }
 0x158   : > { %v2364_v11 = vpack.c.bf16 %v1590_v5, %v1589_v1  ;;  %v2444_v12 = vpack.c.bf16 %v1622_v6, %v1621_v2  ;;  %v1527_v13 = vadd.f32 %v3040_v21, %v1456_v7  ;;  %v1559_v14 = vadd.f32 %v3040_v21, %v1488_v8 }
 0x159   : > { %v914_v15 = vpop.f32.mrf.mxu0  ;;  %v1042_v16 = vpop.f32.mrf.mxu1 }
 0x15a   : > { %2492 = vst [vmem:[%s3056_s14 + $0x38] sm:$0xff] %v2364_v11   ;;  %2508 = vst [vmem:[%s3056_s14 + $0xb8] sm:$0xff] %v2444_v12   ;;  %v1457_v18 = vmul.f32 %v3034_v17, %v914_v15  ;;  %v1489_v19 = vmul.f32 %v3034_v17, %v1042_v16  ;;  %v1591_v25 = vmax.f32 %v1527_v13, 0.0  ;;  %v1623_v26 = vmax.f32 %v1559_v14, 0.0 }
 0x15b   : > { %v916_v20 = vpop.f32.mrf.mxu0  ;;  %v1044_v22 = vpop.f32.mrf.mxu1 }
 0x15c   : > { %v1528_v23 = vadd.f32 %v3040_v21, %v1457_v18  ;;  %v1560_v24 = vadd.f32 %v3040_v21, %v1489_v19 }
 0x15d   : > { %v919_v27 = vpop.f32.mrf.mxu0  ;;  %v1047_v28 = vpop.f32.mrf.mxu1 }
 0x15e   : > { %v1592_v29 = vmax.f32 %v1528_v23, 0.0  ;;  %v1624_v30 = vmax.f32 %v1560_v24, 0.0  ;;  %v1458_v31 = vmul.f32 %v3034_v17, %v919_v27  ;;  %v1490_v32 = vmul.f32 %v3034_v17, %v1047_v28 }
 0x15f   : > { %v921_v33 = vpop.f32.mrf.mxu0  ;;  %v1049_v34 = vpop.f32.mrf.mxu1 }
 0x160   : > { %v2369_v35 = vpack.c.bf16 %v1592_v29, %v1591_v25  ;;  %v2449_v36 = vpack.c.bf16 %v1624_v30, %v1623_v26  ;;  %v1529_v37 = vadd.f32 %v3040_v21, %v1458_v31  ;;  %v1561_v38 = vadd.f32 %v3040_v21, %v1490_v32 }
 0x161   : > { %v922_v39 = vpop.f32.mrf.mxu0  ;;  %v1050_v40 = vpop.f32.mrf.mxu1 }
 0x162   : > { %2493 = vst [vmem:[%s3056_s14 + $0x40] sm:$0xff] %v2369_v35   ;;  %2509 = vst [vmem:[%s3056_s14 + $0xc0] sm:$0xff] %v2449_v36   ;;  %v1459_v41 = vmul.f32 %v3034_v17, %v922_v39  ;;  %v1491_v42 = vmul.f32 %v3034_v17, %v1050_v40  ;;  %v1593_v47 = vmax.f32 %v1529_v37, 0.0  ;;  %v1625_v48 = vmax.f32 %v1561_v38, 0.0 }
 0x163   : > { %v924_v43 = vpop.f32.mrf.mxu0  ;;  %v1052_v44 = vpop.f32.mrf.mxu1 }
 0x164   : > { %v1530_v45 = vadd.f32 %v3040_v21, %v1459_v41  ;;  %v1562_v46 = vadd.f32 %v3040_v21, %v1491_v42 }
 0x165   : > { %v927_v49 = vpop.f32.mrf.mxu0  ;;  %v1055_v50 = vpop.f32.mrf.mxu1 }
 0x166   : > { %v1594_v51 = vmax.f32 %v1530_v45, 0.0  ;;  %v1626_v52 = vmax.f32 %v1562_v46, 0.0  ;;  %v1460_v53 = vmul.f32 %v3034_v17, %v927_v49  ;;  %v1492_v54 = vmul.f32 %v3034_v17, %v1055_v50 }
 0x167   : > { %v929_v55 = vpop.f32.mrf.mxu0  ;;  %v1057_v56 = vpop.f32.mrf.mxu1 }
 0x168   : > { %v2374_v57 = vpack.c.bf16 %v1594_v51, %v1593_v47  ;;  %v2454_v58 = vpack.c.bf16 %v1626_v52, %v1625_v48  ;;  %v1531_v59 = vadd.f32 %v3040_v21, %v1460_v53  ;;  %v1563_v60 = vadd.f32 %v3040_v21, %v1492_v54 }
 0x169   : > { %v930_v61 = vpop.f32.mrf.mxu0  ;;  %v1058_v62 = vpop.f32.mrf.mxu1 }
 0x16a   : > { %2494 = vst [vmem:[%s3056_s14 + $0x48] sm:$0xff] %v2374_v57   ;;  %2510 = vst [vmem:[%s3056_s14 + $0xc8] sm:$0xff] %v2454_v58   ;;  %v1461_v63 = vmul.f32 %v3034_v17, %v930_v61  ;;  %v1493_v0 = vmul.f32 %v3034_v17, %v1058_v62  ;;  %v1595_v5 = vmax.f32 %v1531_v59, 0.0  ;;  %v1627_v6 = vmax.f32 %v1563_v60, 0.0 }
 0x16b   : > { %v932_v1 = vpop.f32.mrf.mxu0  ;;  %v1060_v2 = vpop.f32.mrf.mxu1 }
 0x16c   : > { %v1532_v3 = vadd.f32 %v3040_v21, %v1461_v63  ;;  %v1564_v4 = vadd.f32 %v3040_v21, %v1493_v0 }
 0x16d   : > { %v935_v7 = vpop.f32.mrf.mxu0  ;;  %v1063_v8 = vpop.f32.mrf.mxu1 }
 0x16e   : > { %v1596_v9 = vmax.f32 %v1532_v3, 0.0  ;;  %v1628_v10 = vmax.f32 %v1564_v4, 0.0  ;;  %v1462_v11 = vmul.f32 %v3034_v17, %v935_v7  ;;  %v1494_v12 = vmul.f32 %v3034_v17, %v1063_v8 }
 0x16f   : > { %v937_v13 = vpop.f32.mrf.mxu0  ;;  %v1065_v14 = vpop.f32.mrf.mxu1 }
 0x170   : > { %v2379_v15 = vpack.c.bf16 %v1596_v9, %v1595_v5  ;;  %v2459_v16 = vpack.c.bf16 %v1628_v10, %v1627_v6  ;;  %v1533_v18 = vadd.f32 %v3040_v21, %v1462_v11  ;;  %v1565_v19 = vadd.f32 %v3040_v21, %v1494_v12 }
 0x171   : > { %v938_v20 = vpop.f32.mrf.mxu0  ;;  %v1066_v22 = vpop.f32.mrf.mxu1 }
 0x172   : > { %2495 = vst [vmem:[%s3056_s14 + $0x50] sm:$0xff] %v2379_v15   ;;  %2511 = vst [vmem:[%s3056_s14 + $0xd0] sm:$0xff] %v2459_v16   ;;  %v1463_v23 = vmul.f32 %v3034_v17, %v938_v20  ;;  %v1495_v24 = vmul.f32 %v3034_v17, %v1066_v22  ;;  %v1597_v29 = vmax.f32 %v1533_v18, 0.0  ;;  %v1629_v30 = vmax.f32 %v1565_v19, 0.0 }
 0x173   : > { %v940_v25 = vpop.f32.mrf.mxu0  ;;  %v1068_v26 = vpop.f32.mrf.mxu1 }
 0x174   : > { %v1534_v27 = vadd.f32 %v3040_v21, %v1463_v23  ;;  %v1566_v28 = vadd.f32 %v3040_v21, %v1495_v24 }
 0x175   : > { %v943_v31 = vpop.f32.mrf.mxu0  ;;  %v1071_v32 = vpop.f32.mrf.mxu1 }
 0x176   : > { %v1598_v33 = vmax.f32 %v1534_v27, 0.0  ;;  %v1630_v34 = vmax.f32 %v1566_v28, 0.0  ;;  %v1464_v35 = vmul.f32 %v3034_v17, %v943_v31  ;;  %v1496_v36 = vmul.f32 %v3034_v17, %v1071_v32 }
 0x177   : > { %v945_v37 = vpop.f32.mrf.mxu0  ;;  %v1073_v38 = vpop.f32.mrf.mxu1 }
 0x178   : > { %v2384_v39 = vpack.c.bf16 %v1598_v33, %v1597_v29  ;;  %v2464_v40 = vpack.c.bf16 %v1630_v34, %v1629_v30  ;;  %v1535_v41 = vadd.f32 %v3040_v21, %v1464_v35  ;;  %v1567_v42 = vadd.f32 %v3040_v21, %v1496_v36 }
 0x179   : > { %v946_v43 = vpop.f32.mrf.mxu0  ;;  %v1074_v44 = vpop.f32.mrf.mxu1 }
 0x17a   : > { %2496 = vst [vmem:[%s3056_s14 + $0x58] sm:$0xff] %v2384_v39   ;;  %2512 = vst [vmem:[%s3056_s14 + $0xd8] sm:$0xff] %v2464_v40   ;;  %v1465_v45 = vmul.f32 %v3034_v17, %v946_v43  ;;  %v1497_v46 = vmul.f32 %v3034_v17, %v1074_v44  ;;  %v1599_v51 = vmax.f32 %v1535_v41, 0.0  ;;  %v1631_v52 = vmax.f32 %v1567_v42, 0.0 }
 0x17b   : > { %v948_v47 = vpop.f32.mrf.mxu0  ;;  %v1076_v48 = vpop.f32.mrf.mxu1 }
 0x17c   : > { %v1536_v49 = vadd.f32 %v3040_v21, %v1465_v45  ;;  %v1568_v50 = vadd.f32 %v3040_v21, %v1497_v46 }
 0x17d   : > { %v951_v53 = vpop.f32.mrf.mxu0  ;;  %v1079_v54 = vpop.f32.mrf.mxu1 }
 0x17e   : > { %v1600_v55 = vmax.f32 %v1536_v49, 0.0  ;;  %v1632_v56 = vmax.f32 %v1568_v50, 0.0  ;;  %v1466_v57 = vmul.f32 %v3034_v17, %v951_v53  ;;  %v1498_v58 = vmul.f32 %v3034_v17, %v1079_v54 }
 0x17f   : > { %v953_v59 = vpop.f32.mrf.mxu0  ;;  %v1081_v60 = vpop.f32.mrf.mxu1 }
 0x180   : > { %v2389_v61 = vpack.c.bf16 %v1600_v55, %v1599_v51  ;;  %v2469_v62 = vpack.c.bf16 %v1632_v56, %v1631_v52  ;;  %v1537_v63 = vadd.f32 %v3040_v21, %v1466_v57  ;;  %v1569_v0 = vadd.f32 %v3040_v21, %v1498_v58 }
 0x181   : > { %v954_v1 = vpop.f32.mrf.mxu0  ;;  %v1082_v2 = vpop.f32.mrf.mxu1 }
 0x182   : > { %2497 = vst [vmem:[%s3056_s14 + $0x60] sm:$0xff] %v2389_v61   ;;  %2513 = vst [vmem:[%s3056_s14 + $0xe0] sm:$0xff] %v2469_v62   ;;  %v1467_v3 = vmul.f32 %v3034_v17, %v954_v1  ;;  %v1499_v4 = vmul.f32 %v3034_v17, %v1082_v2  ;;  %v1601_v9 = vmax.f32 %v1537_v63, 0.0  ;;  %v1633_v10 = vmax.f32 %v1569_v0, 0.0 }
 0x183   : > { %v956_v5 = vpop.f32.mrf.mxu0  ;;  %v1084_v6 = vpop.f32.mrf.mxu1 }
 0x184   : > { %v1538_v7 = vadd.f32 %v3040_v21, %v1467_v3  ;;  %v1570_v8 = vadd.f32 %v3040_v21, %v1499_v4 }
 0x185   : > { %v959_v11 = vpop.f32.mrf.mxu0  ;;  %v1087_v12 = vpop.f32.mrf.mxu1 }
 0x186   : > { %v1602_v13 = vmax.f32 %v1538_v7, 0.0  ;;  %v1634_v14 = vmax.f32 %v1570_v8, 0.0  ;;  %v1468_v15 = vmul.f32 %v3034_v17, %v959_v11  ;;  %v1500_v16 = vmul.f32 %v3034_v17, %v1087_v12 }
 0x187   : > { %v961_v18 = vpop.f32.mrf.mxu0  ;;  %v1089_v19 = vpop.f32.mrf.mxu1 }
 0x188   : > { %v2394_v20 = vpack.c.bf16 %v1602_v13, %v1601_v9  ;;  %v2474_v22 = vpack.c.bf16 %v1634_v14, %v1633_v10  ;;  %v1539_v23 = vadd.f32 %v3040_v21, %v1468_v15  ;;  %v1571_v24 = vadd.f32 %v3040_v21, %v1500_v16 }
 0x189   : > { %v962_v25 = vpop.f32.mrf.mxu0  ;;  %v1090_v26 = vpop.f32.mrf.mxu1 }
 0x18a   : > { %2498 = vst [vmem:[%s3056_s14 + $0x68] sm:$0xff] %v2394_v20   ;;  %2514 = vst [vmem:[%s3056_s14 + $0xe8] sm:$0xff] %v2474_v22   ;;  %v1469_v27 = vmul.f32 %v3034_v17, %v962_v25  ;;  %v1501_v28 = vmul.f32 %v3034_v17, %v1090_v26  ;;  %v1603_v33 = vmax.f32 %v1539_v23, 0.0  ;;  %v1635_v34 = vmax.f32 %v1571_v24, 0.0 }
 0x18b   : > { %v964_v29 = vpop.f32.mrf.mxu0  ;;  %v1092_v30 = vpop.f32.mrf.mxu1 }
 0x18c   : > { %v1540_v31 = vadd.f32 %v3040_v21, %v1469_v27  ;;  %v1572_v32 = vadd.f32 %v3040_v21, %v1501_v28 }
 0x18d   : > { %v967_v35 = vpop.f32.mrf.mxu0  ;;  %v1095_v36 = vpop.f32.mrf.mxu1 }
 0x18e   : > { %v1604_v37 = vmax.f32 %v1540_v31, 0.0  ;;  %v1636_v38 = vmax.f32 %v1572_v32, 0.0  ;;  %v1470_v39 = vmul.f32 %v3034_v17, %v967_v35  ;;  %v1502_v40 = vmul.f32 %v3034_v17, %v1095_v36 }
 0x18f   : > { %v969_v41 = vpop.f32.mrf.mxu0  ;;  %v1097_v42 = vpop.f32.mrf.mxu1 }
 0x190   : > { %v2399_v43 = vpack.c.bf16 %v1604_v37, %v1603_v33  ;;  %v2479_v44 = vpack.c.bf16 %v1636_v38, %v1635_v34  ;;  %v1541_v47 = vadd.f32 %v3040_v21, %v1470_v39  ;;  %v1573_v48 = vadd.f32 %v3040_v21, %v1502_v40 }
 0x191   : > { %v970_v45 = vpop.f32.mrf.mxu0  ;;  %v1098_v46 = vpop.f32.mrf.mxu1 }
 0x192   : > { %2499 = vst [vmem:[%s3056_s14 + $0x70] sm:$0xff] %v2399_v43   ;;  %2515 = vst [vmem:[%s3056_s14 + $0xf0] sm:$0xff] %v2479_v44   ;;  %v1471_v49 = vmul.f32 %v3034_v17, %v970_v45  ;;  %v1503_v50 = vmul.f32 %v3034_v17, %v1098_v46  ;;  %v1605_v55 = vmax.f32 %v1541_v47, 0.0  ;;  %v1637_v56 = vmax.f32 %v1573_v48, 0.0 }
 0x193   : > { %v972_v51 = vpop.f32.mrf.mxu0  ;;  %v1100_v52 = vpop.f32.mrf.mxu1 }
 0x194   : > { %v1542_v53 = vadd.f32 %v3040_v21, %v1471_v49  ;;  %v1574_v54 = vadd.f32 %v3040_v21, %v1503_v50 }
 0x196   : > { %v1606_v57 = vmax.f32 %v1542_v53, 0.0  ;;  %v1638_v58 = vmax.f32 %v1574_v54, 0.0 }
 0x198   : > { %v2404_v17 = vpack.c.bf16 %v1606_v57, %v1605_v55  ;;  %v2484_v59 = vpack.c.bf16 %v1638_v58, %v1637_v56 }
 0x19a   : > { %2500 = vst [vmem:[%s3056_s14 + $0x78] sm:$0xff] %v2404_v17   ;;  %2516 = vst [vmem:[%s3056_s14 + $0xf8] sm:$0xff] %v2484_v59  }
 0x19b   : > { %2732 = shalt.err (!%p2729_p5)
}
 0x19c   : > { %s2733_s9 = scalar_lea.hbm %s3209_s30, 4096  ;;  %s2737_s12 = scalar_lea.hbm %s3266_s4, 16384 }
 0x19d   : > { %p2734_p6 = scmp.ne.s32.totalorder %s3209_s30, %s2733_s9  ;;  %p2738_p10 = scmp.lt.s32.totalorder %s3209_s30, %s3266_s4 }
 0x19e   : > { %p2739_p11 = scmp.lt.s32.totalorder %s2737_s12, %s2733_s9 }
 0x19f   : > { %p2735_p7 = pnand %p2734_p6, %p2866_p4 }
 0x1a0   : > { %p2740_p12 = por %p2739_p11, %p2738_p10 }
 0x1a1   : > { %p2736_p9 = pneg %p2735_p7 }
 0x1a3   : > { %p2741_p13 = pnand %p2740_p12, %p2736_p9 }
 0x1a5   : > { %2744 = shalt.err (!%p2741_p13)
}
 0x1a6   : > { %s2799_s14 = smov 64   ;;  %s2800_s21 = smov 4  }
 0x1a7   : > { %2549 = dma.vmem_to_hbm [thread:$0]  (%p2866_p4), %s3211_s22, 4096, %s3209_s30, %s3217_s18, %s2799_s14, %s2799_s14, %s2800_s21  }
 0x1a8 PF: > { %p2555_p0 = scmp.ge.s32.totalorder %s2795_s20, 2  ;;  %s1989_s26 = sand.u32 1, %s2775_s15  }
 0x1a9   : > { %s1990_s29 = scalar_lea.sflag [#allocation4], %s1989_s26 }
 0x1aa   : > { %p2552_p1 = pnand %p2555_p0, %p2873_p8 }
 0x1ac   : > { %p2553_p2 = pneg %p2552_p1 }
 0x1ae   : > { %2770 = dma.done.wait (%p2553_p2), %s1990_s29, 4096  }
 0x1af   : > { %2772 = vsyncadd (%p2553_p2), %s1990_s29, 4294963200  ;;  %s17_s20 = sadd.s32 1, %s2795_s20   ;;  %s3269_s15 = smov %s2779_s16 }
 0x1b0   : > { %p14_p3 = scmp.ge.s32.totalorder %s17_s20, 6   ;;  %s3270_s16 = smov %s2783_s17 }
 0x1b1   : > { %s3271_s17 = smov %s2879_s28  ;;  %s3272_s18 = smov %s2791_s19 }
 0x1b2   : > { %s3273_s19 = smov %s3275_s23  ;;  %16 = sbr.rel (!%p14_p3) target bundleno = 4 (0x4), region = 92 }
 0x1b7   :  { %1995 = vsyncpa [#allocation4], 1 }
 0x1b8   :  { %1997 = vsyncpa [#allocation4 + $0x1], 1 }

</bundles_post_ra>
